<compile_context>
chip_gen: v5e
topology: v5e:2x2
jax: 0.10.0
libtpu: 0.0.40
codegen_flags: <defaults>
</compile_context>

<pallas_src>
import functools

import jax
import jax.numpy as jnp
from jax.experimental import pallas as pl
from jax.experimental.pallas import tpu as pltpu


def _focal_kernel(x_ref, t_ref, out_ref, *, gamma, int_gamma, alpha,
                  num_classes, r_fold):
    # x_ref: (C, R, 128) logits block, t_ref: (R, 128) int targets (-1 = pad)
    t = t_ref[...]

    # class max over the C leading slabs: pure VPU, no XLU
    m = x_ref[0].astype(jnp.float32)
    for c in range(1, num_classes):
        m = jnp.maximum(m, x_ref[c].astype(jnp.float32))

    sumexp = jnp.zeros_like(m)
    xt_m = jnp.zeros_like(m)      # (x_t - m) gathered via one-hot selects
    expt = jnp.zeros_like(m)      # exp(x_t - m), reused for pt (no extra exp)
    at = jnp.zeros_like(m)        # alpha_t (== 0 on pad / out-of-range labels)
    for c in range(num_classes):
        d = x_ref[c].astype(jnp.float32) - m
        e = jnp.exp(d)
        sumexp = sumexp + e
        hit = t == c
        xt_m = xt_m + jnp.where(hit, d, 0.0)
        expt = expt + jnp.where(hit, e, 0.0)
        at = at + jnp.where(hit, jnp.float32(alpha[c]), 0.0)

    logpt = xt_m - jnp.log(sumexp)                 # log p_t
    pt = expt / sumexp                             # reuse exp(x - m)
    one_minus_pt = jnp.maximum(1.0 - pt, 0.0)      # avoid (neg)**gamma NaN

    if int_gamma is not None:
        # small-integer gamma: repeated multiply (VALU), keeps EUP free
        focal = jnp.ones_like(pt)
        for _ in range(int_gamma):
            focal = focal * one_minus_pt
    else:
        focal = one_minus_pt ** gamma

    # at == 0 on padded columns (target = -1) -> loss == 0; no extra mask.
    loss = -focal * (logpt * at)                   # (R, 128)

    # fold (R, 128) -> (8, 128) with VALU adds; lane-dense unmasked store.
    folded = loss.reshape(r_fold, 8, 128).sum(axis=0)
    out_ref[...] = folded


def focal_loss(logits_nchw, target_nhw, *, gamma=0.0, alpha=None,
               size_average=True, target_block_bytes=None):
    N, C, H, W = logits_nchw.shape
    S = H * W
    LANE, SUB = 128, 8
    PIX_Q = LANE * SUB  # 1024-pixel quantum keeps (8,128) blocks

    # --- alpha handling, mirroring the PyTorch module (compile-time consts) ---
    if isinstance(alpha, (float, int)):
        alpha = [float(alpha), 1.0 - float(alpha)]
    if alpha is None:
        alpha_list = [1.0] * C
    else:
        alpha_list = [float(a) for a in alpha]
        assert len(alpha_list) == C, "alpha must have one weight per class"

    # --- per-generation tile / VMEM sizing ---
    try:
        vmem_cap = int(pltpu.get_tpu_info().vmem_capacity_bytes)
    except Exception:
        vmem_cap = 64 * 1024 * 1024
    if target_block_bytes is None:
        # ~12 MiB blocks on 128 MiB VMEM (v5e/v6e), ~6.4 MiB on 64 MiB (v7x)
        target_block_bytes = max(2 << 20, min(12 << 20, vmem_cap // 10))

    x_itemsize = jnp.dtype(logits_nchw.dtype).itemsize
    ts = max(PIX_Q,
             (target_block_bytes // (x_itemsize * C)) // PIX_Q * PIX_Q)
    ts = min(ts, pl.cdiv(S, PIX_Q) * PIX_Q)
    s_pad = pl.cdiv(S, ts) * ts

    # --- free reshape NCHW -> (N, C, S); no HBM-round-trip transpose ---
    x = logits_nchw.reshape(N, C, S)
    t = target_nhw.reshape(N, S)
    if not jnp.issubdtype(t.dtype, jnp.integer):
        t = t.astype(jnp.int32)
    if s_pad != S:
        x = jnp.pad(x, ((0, 0), (0, 0), (0, s_pad - S)))
        t = jnp.pad(t, ((0, 0), (0, s_pad - S)), constant_values=-1)

    # free row-major split of the spatial axis -> lanes on the trailing dim
    r_total = s_pad // LANE
    x = x.reshape(N, C, r_total, LANE)
    t = t.reshape(N, r_total, LANE)

    r_blk = ts // LANE            # multiple of 8
    num_s = s_pad // ts
    grid = (N, num_s)

    blk_x_bytes = C * ts * x_itemsize
    vmem_limit = min(int(0.85 * vmem_cap),
                     max(48 << 20, 5 * blk_x_bytes + (16 << 20)))

    g = float(gamma)
    int_gamma = int(g) if (g.is_integer() and 0.0 <= g <= 8.0) else None
    kernel = functools.partial(_focal_kernel, gamma=g, int_gamma=int_gamma,
                               alpha=tuple(alpha_list), num_classes=C,
                               r_fold=r_blk // SUB)

    partials = pl.pallas_call(
        kernel,
        out_shape=jax.ShapeDtypeStruct((N, num_s, SUB, LANE), jnp.float32),
        grid_spec=pltpu.PrefetchScalarGridSpec(
            num_scalar_prefetch=0,
            grid=grid,
            in_specs=[
                pl.BlockSpec((None, C, r_blk, LANE),
                             lambda n, s: (n, 0, s, 0)),      # logits
                pl.BlockSpec((None, r_blk, LANE),
                             lambda n, s: (n, s, 0)),         # targets
            ],
            out_specs=pl.BlockSpec((None, None, SUB, LANE),
                                   lambda n, s: (n, s, 0, 0)),
        ),
        compiler_params=pltpu.CompilerParams(
            dimension_semantics=("parallel", "parallel"),
            vmem_limit_bytes=int(vmem_limit)),
    )(x, t)

    total = jnp.sum(partials)      # tiny final reduction in the wrapper
    if size_average:
        total = total / jnp.float32(N * S)
    return total


def _focal_loss_ref(logits_nchw, target_nhw, *, gamma, alpha, size_average):
    # pure-JAX reference mirroring the PyTorch forward
    N, C, H, W = logits_nchw.shape
    x = jnp.transpose(logits_nchw, (0, 2, 3, 1)).reshape(-1, C)
    t = target_nhw.reshape(-1).astype(jnp.int32)
    logp = jax.nn.log_softmax(x, axis=1)
    logpt = jnp.take_along_axis(logp, t[:, None], axis=1)[:, 0]
    pt = jnp.exp(logpt)
    if alpha is not None:
        at = jnp.asarray(alpha, jnp.float32)[t]
        logpt = logpt * at
    loss = -((1.0 - pt) ** gamma) * logpt
    return loss.mean() if size_average else loss.sum()


if __name__ == "__main__":
    key = jax.random.PRNGKey(0)
    k1, k2 = jax.random.split(key)

    N, C, H, W = 2, 4, 16, 16
    logits = jax.random.normal(k1, (N, C, H, W), dtype=jnp.float32)
    target = jax.random.randint(k2, (N, H, W), 0, C, dtype=jnp.int32)

    gamma = 2.0
    alpha = [0.1, 0.2, 0.3, 0.4]   # per-class weights (len == C)

    out = focal_loss(logits, target, gamma=gamma, alpha=alpha,
                     size_average=True)
    out = jax.block_until_ready(out)

    ref = _focal_loss_ref(logits, target, gamma=gamma, alpha=alpha,
                          size_average=True)
    assert jnp.allclose(out, ref, rtol=1e-5, atol=1e-5), (out, ref)

    print("KERNEL_OK")
</pallas_src>

<mosaic_0001>
module attributes {stable_mosaic.version = 11 : i64} {
  func.func @_focal_kernel(%arg0: i32, %arg1: i32, %arg2: memref<1x4x8x128xf32, #tpu.memory_space<vmem>>, %arg3: memref<1x8x128xi32, #tpu.memory_space<vmem>>, %arg4: memref<1x1x8x128xf32, #tpu.memory_space<vmem>>) attributes {dimension_semantics = [#tpu.dimension_semantics<parallel>, #tpu.dimension_semantics<parallel>], iteration_bounds = array<i64: 2, 1>, scalar_prefetch = 0 : i64, scratch_operands = 0 : i64, tpu.core_type = #tpu.core_type<tc>, window_params = [{transform_indices = @transform_0, window_bounds = array<i64: 1, 4, 8, 128>}, {transform_indices = @transform_1, window_bounds = array<i64: 1, 8, 128>}, {transform_indices = @transform_2, window_bounds = array<i64: 1, 1, 8, 128>}]} {
    %c0 = arith.constant 0 : index
    %c0_0 = arith.constant 0 : index
    %c0_1 = arith.constant 0 : index
    %0 = vector.load %arg3[%c0, %c0_0, %c0_1] : memref<1x8x128xi32, #tpu.memory_space<vmem>>, vector<1x8x128xi32>
    %1 = vector.shape_cast %0 : vector<1x8x128xi32> to vector<8x128xi32>
    %c0_2 = arith.constant 0 : index
    %c0_3 = arith.constant 0 : index
    %c0_4 = arith.constant 0 : index
    %c0_5 = arith.constant 0 : index
    %2 = vector.load %arg2[%c0_2, %c0_3, %c0_4, %c0_5] : memref<1x4x8x128xf32, #tpu.memory_space<vmem>>, vector<1x1x8x128xf32>
    %3 = vector.shape_cast %2 : vector<1x1x8x128xf32> to vector<8x128xf32>
    %c0_6 = arith.constant 0 : index
    %c1 = arith.constant 1 : index
    %c0_7 = arith.constant 0 : index
    %c0_8 = arith.constant 0 : index
    %4 = vector.load %arg2[%c0_6, %c1, %c0_7, %c0_8] : memref<1x4x8x128xf32, #tpu.memory_space<vmem>>, vector<1x1x8x128xf32>
    %5 = vector.shape_cast %4 : vector<1x1x8x128xf32> to vector<8x128xf32>
    %6 = arith.maximumf %3, %5 : vector<8x128xf32>
    %c0_9 = arith.constant 0 : index
    %c2 = arith.constant 2 : index
    %c0_10 = arith.constant 0 : index
    %c0_11 = arith.constant 0 : index
    %7 = vector.load %arg2[%c0_9, %c2, %c0_10, %c0_11] : memref<1x4x8x128xf32, #tpu.memory_space<vmem>>, vector<1x1x8x128xf32>
    %8 = vector.shape_cast %7 : vector<1x1x8x128xf32> to vector<8x128xf32>
    %9 = arith.maximumf %6, %8 : vector<8x128xf32>
    %c0_12 = arith.constant 0 : index
    %c3 = arith.constant 3 : index
    %c0_13 = arith.constant 0 : index
    %c0_14 = arith.constant 0 : index
    %10 = vector.load %arg2[%c0_12, %c3, %c0_13, %c0_14] : memref<1x4x8x128xf32, #tpu.memory_space<vmem>>, vector<1x1x8x128xf32>
    %11 = vector.shape_cast %10 : vector<1x1x8x128xf32> to vector<8x128xf32>
    %12 = arith.maximumf %9, %11 : vector<8x128xf32>
    %cst = arith.constant 0.000000e+00 : f32
    %13 = vector.broadcast %cst : f32 to vector<8x128xf32>
    %cst_15 = arith.constant 0.000000e+00 : f32
    %14 = vector.broadcast %cst_15 : f32 to vector<8x128xf32>
    %cst_16 = arith.constant 0.000000e+00 : f32
    %15 = vector.broadcast %cst_16 : f32 to vector<8x128xf32>
    %cst_17 = arith.constant 0.000000e+00 : f32
    %16 = vector.broadcast %cst_17 : f32 to vector<8x128xf32>
    %c0_18 = arith.constant 0 : index
    %c0_19 = arith.constant 0 : index
    %c0_20 = arith.constant 0 : index
    %c0_21 = arith.constant 0 : index
    %17 = vector.load %arg2[%c0_18, %c0_19, %c0_20, %c0_21] : memref<1x4x8x128xf32, #tpu.memory_space<vmem>>, vector<1x1x8x128xf32>
    %18 = vector.shape_cast %17 : vector<1x1x8x128xf32> to vector<8x128xf32>
    %19 = arith.subf %18, %12 : vector<8x128xf32>
    %20 = math.exp %19 : vector<8x128xf32>
    %21 = arith.addf %13, %20 : vector<8x128xf32>
    %c0_i32 = arith.constant 0 : i32
    %22 = vector.broadcast %c0_i32 : i32 to vector<8x128xi32>
    %23 = arith.cmpi eq, %1, %22 : vector<8x128xi32>
    %cst_22 = arith.constant 0.000000e+00 : f32
    %24 = vector.broadcast %cst_22 : f32 to vector<8x128xf32>
    %25 = arith.select %23, %19, %24 : vector<8x128xi1>, vector<8x128xf32>
    %26 = arith.addf %14, %25 : vector<8x128xf32>
    %cst_23 = arith.constant 0.000000e+00 : f32
    %27 = vector.broadcast %cst_23 : f32 to vector<8x128xf32>
    %28 = arith.select %23, %20, %27 : vector<8x128xi1>, vector<8x128xf32>
    %29 = arith.addf %15, %28 : vector<8x128xf32>
    %cst_24 = arith.constant 1.000000e-01 : f32
    %cst_25 = arith.constant 0.000000e+00 : f32
    %30 = vector.broadcast %cst_24 : f32 to vector<8x128xf32>
    %31 = vector.broadcast %cst_25 : f32 to vector<8x128xf32>
    %32 = arith.select %23, %30, %31 : vector<8x128xi1>, vector<8x128xf32>
    %33 = arith.addf %16, %32 : vector<8x128xf32>
    %c0_26 = arith.constant 0 : index
    %c1_27 = arith.constant 1 : index
    %c0_28 = arith.constant 0 : index
    %c0_29 = arith.constant 0 : index
    %34 = vector.load %arg2[%c0_26, %c1_27, %c0_28, %c0_29] : memref<1x4x8x128xf32, #tpu.memory_space<vmem>>, vector<1x1x8x128xf32>
    %35 = vector.shape_cast %34 : vector<1x1x8x128xf32> to vector<8x128xf32>
    %36 = arith.subf %35, %12 : vector<8x128xf32>
    %37 = math.exp %36 : vector<8x128xf32>
    %38 = arith.addf %21, %37 : vector<8x128xf32>
    %c1_i32 = arith.constant 1 : i32
    %39 = vector.broadcast %c1_i32 : i32 to vector<8x128xi32>
    %40 = arith.cmpi eq, %1, %39 : vector<8x128xi32>
    %cst_30 = arith.constant 0.000000e+00 : f32
    %41 = vector.broadcast %cst_30 : f32 to vector<8x128xf32>
    %42 = arith.select %40, %36, %41 : vector<8x128xi1>, vector<8x128xf32>
    %43 = arith.addf %26, %42 : vector<8x128xf32>
    %cst_31 = arith.constant 0.000000e+00 : f32
    %44 = vector.broadcast %cst_31 : f32 to vector<8x128xf32>
    %45 = arith.select %40, %37, %44 : vector<8x128xi1>, vector<8x128xf32>
    %46 = arith.addf %29, %45 : vector<8x128xf32>
    %cst_32 = arith.constant 2.000000e-01 : f32
    %cst_33 = arith.constant 0.000000e+00 : f32
    %47 = vector.broadcast %cst_32 : f32 to vector<8x128xf32>
    %48 = vector.broadcast %cst_33 : f32 to vector<8x128xf32>
    %49 = arith.select %40, %47, %48 : vector<8x128xi1>, vector<8x128xf32>
    %50 = arith.addf %33, %49 : vector<8x128xf32>
    %c0_34 = arith.constant 0 : index
    %c2_35 = arith.constant 2 : index
    %c0_36 = arith.constant 0 : index
    %c0_37 = arith.constant 0 : index
    %51 = vector.load %arg2[%c0_34, %c2_35, %c0_36, %c0_37] : memref<1x4x8x128xf32, #tpu.memory_space<vmem>>, vector<1x1x8x128xf32>
    %52 = vector.shape_cast %51 : vector<1x1x8x128xf32> to vector<8x128xf32>
    %53 = arith.subf %52, %12 : vector<8x128xf32>
    %54 = math.exp %53 : vector<8x128xf32>
    %55 = arith.addf %38, %54 : vector<8x128xf32>
    %c2_i32 = arith.constant 2 : i32
    %56 = vector.broadcast %c2_i32 : i32 to vector<8x128xi32>
    %57 = arith.cmpi eq, %1, %56 : vector<8x128xi32>
    %cst_38 = arith.constant 0.000000e+00 : f32
    %58 = vector.broadcast %cst_38 : f32 to vector<8x128xf32>
    %59 = arith.select %57, %53, %58 : vector<8x128xi1>, vector<8x128xf32>
    %60 = arith.addf %43, %59 : vector<8x128xf32>
    %cst_39 = arith.constant 0.000000e+00 : f32
    %61 = vector.broadcast %cst_39 : f32 to vector<8x128xf32>
    %62 = arith.select %57, %54, %61 : vector<8x128xi1>, vector<8x128xf32>
    %63 = arith.addf %46, %62 : vector<8x128xf32>
    %cst_40 = arith.constant 3.000000e-01 : f32
    %cst_41 = arith.constant 0.000000e+00 : f32
    %64 = vector.broadcast %cst_40 : f32 to vector<8x128xf32>
    %65 = vector.broadcast %cst_41 : f32 to vector<8x128xf32>
    %66 = arith.select %57, %64, %65 : vector<8x128xi1>, vector<8x128xf32>
    %67 = arith.addf %50, %66 : vector<8x128xf32>
    %c0_42 = arith.constant 0 : index
    %c3_43 = arith.constant 3 : index
    %c0_44 = arith.constant 0 : index
    %c0_45 = arith.constant 0 : index
    %68 = vector.load %arg2[%c0_42, %c3_43, %c0_44, %c0_45] : memref<1x4x8x128xf32, #tpu.memory_space<vmem>>, vector<1x1x8x128xf32>
    %69 = vector.shape_cast %68 : vector<1x1x8x128xf32> to vector<8x128xf32>
    %70 = arith.subf %69, %12 : vector<8x128xf32>
    %71 = math.exp %70 : vector<8x128xf32>
    %72 = arith.addf %55, %71 : vector<8x128xf32>
    %c3_i32 = arith.constant 3 : i32
    %73 = vector.broadcast %c3_i32 : i32 to vector<8x128xi32>
    %74 = arith.cmpi eq, %1, %73 : vector<8x128xi32>
    %cst_46 = arith.constant 0.000000e+00 : f32
    %75 = vector.broadcast %cst_46 : f32 to vector<8x128xf32>
    %76 = arith.select %74, %70, %75 : vector<8x128xi1>, vector<8x128xf32>
    %77 = arith.addf %60, %76 : vector<8x128xf32>
    %cst_47 = arith.constant 0.000000e+00 : f32
    %78 = vector.broadcast %cst_47 : f32 to vector<8x128xf32>
    %79 = arith.select %74, %71, %78 : vector<8x128xi1>, vector<8x128xf32>
    %80 = arith.addf %63, %79 : vector<8x128xf32>
    %cst_48 = arith.constant 4.000000e-01 : f32
    %cst_49 = arith.constant 0.000000e+00 : f32
    %81 = vector.broadcast %cst_48 : f32 to vector<8x128xf32>
    %82 = vector.broadcast %cst_49 : f32 to vector<8x128xf32>
    %83 = arith.select %74, %81, %82 : vector<8x128xi1>, vector<8x128xf32>
    %84 = arith.addf %67, %83 : vector<8x128xf32>
    %85 = math.log %72 : vector<8x128xf32>
    %86 = arith.subf %77, %85 : vector<8x128xf32>
    %87 = arith.divf %80, %72 : vector<8x128xf32>
    %cst_50 = arith.constant 1.000000e+00 : f32
    %88 = vector.broadcast %cst_50 : f32 to vector<8x128xf32>
    %89 = arith.subf %88, %87 : vector<8x128xf32>
    %cst_51 = arith.constant 0.000000e+00 : f32
    %90 = vector.broadcast %cst_51 : f32 to vector<8x128xf32>
    %91 = arith.maximumf %89, %90 : vector<8x128xf32>
    %cst_52 = arith.constant 1.000000e+00 : f32
    %92 = vector.broadcast %cst_52 : f32 to vector<8x128xf32>
    %93 = arith.mulf %92, %91 : vector<8x128xf32>
    %94 = arith.mulf %93, %91 : vector<8x128xf32>
    %cst_53 = arith.constant 0.000000e+00 : f32
    %95 = vector.broadcast %cst_53 : f32 to vector<8x128xf32>
    %96 = arith.subf %95, %94 : vector<8x128xf32>
    %97 = arith.mulf %86, %84 : vector<8x128xf32>
    %98 = arith.mulf %96, %97 : vector<8x128xf32>
    %99 = vector.shape_cast %98 : vector<8x128xf32> to vector<1x8x128xf32>
    %cst_54 = arith.constant dense<0.000000e+00> : vector<8x128xf32>
    %100 = vector.multi_reduction <add>, %99, %cst_54 [0] : vector<1x8x128xf32> to vector<8x128xf32>
    %c0_55 = arith.constant 0 : index
    %c0_56 = arith.constant 0 : index
    %c0_57 = arith.constant 0 : index
    %c0_58 = arith.constant 0 : index
    %101 = vector.load %arg4[%c0_55, %c0_56, %c0_57, %c0_58] : memref<1x1x8x128xf32, #tpu.memory_space<vmem>>, vector<1x1x8x128xf32>
    %102 = vector.shape_cast %101 : vector<1x1x8x128xf32> to vector<8x128xf32>
    %103 = vector.shape_cast %100 : vector<8x128xf32> to vector<1x1x8x128xf32>
    tpu.vector_store %arg4[%c0_55, %c0_56, %c0_57, %c0_58], %103 {strides = array<i32>} : memref<1x1x8x128xf32, #tpu.memory_space<vmem>>, vector<1x1x8x128xf32>,
    return
  }
  func.func @transform_0(%arg0: i32, %arg1: i32) -> (i32, i32, i32, i32) {
    %c0_i32 = arith.constant 0 : i32
    %c0_i32_0 = arith.constant 0 : i32
    %c0_i32_1 = arith.constant 0 : i32
    return %arg0, %c0_i32, %arg1, %c0_i32_0 : i32, i32, i32, i32
  }
  func.func @transform_1(%arg0: i32, %arg1: i32) -> (i32, i32, i32) {
    %c0_i32 = arith.constant 0 : i32
    %c0_i32_0 = arith.constant 0 : i32
    return %arg0, %arg1, %c0_i32 : i32, i32, i32
  }
  func.func @transform_2(%arg0: i32, %arg1: i32) -> (i32, i32, i32, i32) {
    %c0_i32 = arith.constant 0 : i32
    %c0_i32_0 = arith.constant 0 : i32
    %c0_i32_1 = arith.constant 0 : i32
    return %arg0, %arg1, %c0_i32, %c0_i32_0 : i32, i32, i32, i32
  }
}

</mosaic_0001>

<bundles_post_ra>
// kernel: tpu_custom_call.1
= control target key start
LH: loop header
LB: loop body
LE: loop exit
PB: predicated region body
PF: predicated region fallthrough
CT: control target
= control target key end

     0   :  { %7 = vsyncpa [#allocation3], 0  ;;  %s846_s0 = inlined_call_operand.hbm [shape: f32[2,4,8,128], index: 0, kind: input, shape index: {}]   ;;  %s847_s1 = inlined_call_operand.hbm [shape: s32[2,8,128], index: 1, kind: input, shape index: {}]   ;;  %s848_s2 = inlined_call_operand.hbm [shape: f32[2,1,8,128], index: 2, kind: output, shape index: {}]  }
   0x1   :  { %9 = vsyncpa [#allocation3 + $0x1], 0 }
   0x2   :  { %10 = vsyncpa [#allocation6], 0 }
   0x3   :  { %12 = vsyncpa [#allocation6 + $0x1], 0 }
   0x4   :  { %13 = vsyncpa [#allocation4], 0 }
   0x5   :  { %15 = vsyncpa [#allocation4 + $0x1], 0  ;;  %s695_s9 = smov 0   ;;  %s697_s10 = smov 0  }
   0x6   :  { %s699_s11 = smov 0   ;;  %s701_s12 = smov 0  }
   0x7   :  { %s703_s13 = smov 0   ;;  %s705_s14 = smov 0  }
   0x8 LB: > { %s426_s15 = sadd.s32 4294967295, %s675_s14   ;;  %s427_s16 = sadd.s32 4294967294, %s675_s14   ;;  %s675_s14 = sphi %s705_s14, %s21_s14   ;;  %s671_s13 = sphi %s703_s13, %s858_s13   ;;  %s667_s12 = sphi %s701_s12, %s857_s12   ;;  %s663_s11 = sphi %s699_s11, %s856_s11   ;;  %s659_s10 = sphi %s697_s10, %s855_s10   ;;  %s655_s9 = sphi %s695_s9, %s854_s9  }
   0x9   : > { %s33_s17 = sadd.s32 1, %s671_s13  ;;  %s42_s18 = sadd.s32 1, %s663_s11 }
   0xa   : > { %p35_p0 = scmp.ge.s32.totalorder %s33_s17, 2  ;;  %p49_p1 = scmp.ne.s32.totalorder %s663_s11, %s659_s10 }
   0xb   : > { %p50_p2 = scmp.eq.s32.totalorder %s675_s14, 0  ;;  %p55_p3 = scmp.ne.s32.totalorder %s659_s10, %s655_s9 }
   0xc   : > { %s860_s17 = smov (%p35_p0, %s33_s17), 0  ;;  %p56_p5 = scmp.eq.s32.totalorder %s426_s15, 0 }
   0xd   : > { %p736_p4 = por %p50_p2, %p49_p1  ;;  %s37_s20 = ssub.s32 %s671_s13, %s860_s17 }
   0xe   : > { %p109_p6 = scmp.eq.s32.totalorder %s426_s15, 1  ;;  %p40_p7 = scmp.eq.s32.totalorder %s37_s20, 0 }
   0xf   : > { %p742_p8 = por %p56_p5, %p55_p3  ;;  %p115_p10 = scmp.eq.s32.totalorder %s427_s16, 1 }
  0x10   : > { %p746_p9 = por %p109_p6, %p49_p1  ;;  %p429_p12 = scmp.ge.s32.totalorder %s675_s14, 2 }
  0x11   : > { %s751_s23 = scalar_select %p40_p7, %s663_s11, %s42_s18  }
  0x12   : > { %p753_p11 = por %p115_p10, %p55_p3  ;;  %p464_p13 = scmp.lt.s32.totalorder %s675_s14, 2 }
  0x13   : > { %s135_s25 = sand.u32 1, %s663_s11   ;;  %s446_s27 = sshll.u32 %s671_s13, 5 }
  0x14   : > { %s430_s26 = sshll.u32 %s135_s25, 5  ;;  %s145_s30 = scalar_lea.hbm %s846_s0, %s446_s27 }
  0x15   : > { %s139_s3 = scalar_lea.vmem [#allocation2], %s430_s26  ;;  %s146_s5 = sshll.u32 %s145_s30, 4  ;;  %s147_s5 = int_to_ptr.hbm [resolvable:$true] %s146_s5 }
  0x16   : > { %s148_s4 = sshll.u32 %s139_s3, 4  ;;  %p766_p0 = pnand %p464_p13, %p736_p4  ;;  %s149_s4 = int_to_ptr.vmem [resolvable:$true] %s148_s4 }
  0x17   : > { %p435_p1 = scmp.ge.s32.totalorder %s675_s14, 1  ;;  %s136_s7 = scalar_lea.sflag [#allocation3], %s135_s25 }
  0x18   : > { %s677_s8 = smov 128   ;;  %s678_s15 = smov 8  }
  0x19   : > { %456 = dma.hbm_to_vmem [thread:$0]  (!%p766_p0), %s147_s5, 512, %s149_s4, %s136_s7, %s677_s8, %s677_s8, %s678_s15  }
  0x1a   : > { %p176_p2 = scmp.lt.s32.totalorder %s675_s14, 3  ;;  %s433_s16 = sshll.u32 %s135_s25, 3 }
  0x1b   : > { %s434_s18 = sshll.u32 %s671_s13, 3  ;;  %s162_s27 = scalar_lea.vmem [#allocation5], %s433_s16 }
  0x1c   : > { %p177_p3 = pnand %p435_p1, %p176_p2  ;;  %s167_s19 = scalar_lea.hbm %s847_s1, %s434_s18 }
  0x1d   : > { %s171_s28 = sshll.u32 %s162_s27, 4  ;;  %s169_s29 = sshll.u32 %s167_s19, 4  ;;  %s172_s28 = int_to_ptr.vmem [resolvable:$true] %s171_s28  ;;  %s170_s29 = int_to_ptr.hbm [resolvable:$true] %s169_s29 }
  0x1e   : > { %s159_s30 = scalar_lea.sflag [#allocation6], %s135_s25  ;;  %180 = sbr.rel (%p177_p3) target bundleno = 96 (0x60), region = 28 }
  0x1f   : > { %459 = dma.hbm_to_vmem [thread:$0]  (!%p766_p0), %s170_s29, 128, %s172_s28, %s159_s30  }
  0x20   : > { %s781_s3 = sand.u32 (!%p177_p3), 1, %s659_s10  }
  0x21   : > { %s436_s4 = sshll.u32 (!%p177_p3), %s781_s3, 5  ;;  %s183_s5 = scalar_lea.sflag (!%p177_p3), [#allocation3], %s781_s3 }
  0x22   : > { %s186_s7 = scalar_lea.vmem (!%p177_p3), [#allocation2], %s436_s4 }
  0x23   : > { %642 = dma.done.wait (%p742_p8), %s183_s5, 512  }
  0x24   : > { %644 = vsyncadd (%p742_p8), %s183_s5, 4294966784  ;;  %s437_s25 = sshll.u32 %s781_s3, 3  ;;  %s193_s6 = scalar_lea.sflag [#allocation6], %s781_s3 }
  0x25   : > { %s196_s8 = scalar_lea.vmem [#allocation5], %s437_s25 }
  0x26   : > { %646 = dma.done.wait (%p742_p8), %s193_s6, 128  }
  0x27   : > { %648 = vsyncadd (%p742_p8), %s193_s6, 4294967168  ;;  %v224_v0 = vld [vmem:[%s186_s7] sm:$0xff]  ;;  %v439_v1 = vld [vmem:[%s186_s7 + $0x8] sm:$0xff]  ;;  %v679_v30 = vmov 0.0   ;;  %s443_s21 = sshll.u32 %s667_s12, 3  ;;  %s222_s20 = scalar_lea.vmem [#allocation7], %s437_s25 }
  0x28   : > { %v227_v2 = vmax.f32 %v224_v0, %v439_v1  ;;  %v440_v3 = vld [vmem:[%s186_s7 + $0x10] sm:$0xff]  ;;  %v441_v4 = vld [vmem:[%s186_s7 + $0x18] sm:$0xff]  ;;  %v223_v20 = vld [vmem:[%s196_s8] sm:$0xff]  ;;  %s316_s18 = scalar_lea.hbm %s848_s2, %s443_s21  ;;  %s318_s26 = sshll.u32 %s222_s20, 4  ;;  %s319_s26 = int_to_ptr.vmem [resolvable:$true] %s318_s26 }
  0x29   : > { %vm238_vm0 = vcmp.eq.s32.totalorder %v223_v20, 0  ;;  %vm249_vm1 = vcmp.eq.s32.totalorder %v223_v20, 1  ;;  %vm260_vm2 = vcmp.eq.s32.totalorder %v223_v20, 2  ;;  %vm271_vm3 = vcmp.eq.s32.totalorder %v223_v20, 3  ;;  %s320_s19 = sshll.u32 %s316_s18, 4  ;;  %s305_s12 = scalar_lea.sflag [#allocation4], %s781_s3  ;;  %s321_s19 = int_to_ptr.hbm [resolvable:$true] %s320_s19 }
  0x2a   : > { %v230_v5 = vmax.f32 %v227_v2, %v440_v3  ;;  %v243_v31 = vsel %vm238_vm0, 0.1, %v679_v30  ;;  %v254_v34 = vsel %vm249_vm1, 0.2, %v679_v30  ;;  %v265_v45 = vsel %vm260_vm2, 0.3, %v679_v30 }
  0x2b   : > { %v255_v41 = vadd.f32 %v254_v34, %v243_v31  ;;  %v276_v54 = vsel %vm271_vm3, 0.4, %v679_v30  ;;  %s603_s27 = sshra.s32 %s321_s19, 4  ;;  %s609_s4 = scalar_lea.hbm %s848_s2, 16  ;;  %s604_s27 = int_to_ptr.hbm [resolvable:$true] %s603_s27 }
  0x2c   : > { %v233_v6 = vmax.f32 %v230_v5, %v441_v4  ;;  %s605_s28 = scalar_lea.hbm %s604_s27, 8  ;;  %p610_p7 = scmp.lt.s32.totalorder %s604_s27, %s848_s2 }
  0x2d   : > { %v266_v50 = vadd.f32 %v265_v45, %v255_v41  ;;  %p606_p4 = scmp.ne.s32.totalorder %s604_s27, %s605_s28  ;;  %p611_p8 = scmp.lt.s32.totalorder %s609_s4, %s605_s28 }
  0x2e   : > { %v234_v7 = vsub.f32 %v224_v0, %v233_v6  ;;  %v245_v8 = vsub.f32 %v439_v1, %v233_v6  ;;  %v256_v9 = vsub.f32 %v440_v3, %v233_v6  ;;  %v267_v10 = vsub.f32 %v441_v4, %v233_v6 }
  0x2f   : > { %v277_v57 = vadd.f32 %v276_v54, %v266_v50  ;;  %p607_p5 = pnand %p606_p4, %p746_p9  ;;  %p612_p10 = por %p611_p8, %p610_p7 }
  0x30   : > { %v235_v11 = vmul.f32 1.442695, %v234_v7  ;;  %v246_v12 = vmul.f32 1.442695, %v245_v8  ;;  %v257_v13 = vmul.f32 1.442695, %v256_v9 }
  0x31   : > { %v268_v14 = vmul.f32 1.442695, %v267_v10  ;;  %v239_v25 = vsel %vm238_vm0, %v234_v7, 0.0  ;;  %v250_v26 = vsel %vm249_vm1, %v245_v8, 0.0  ;;  %v261_v35 = vsel %vm260_vm2, %v256_v9, 0.0  ;;  %p608_p6 = pneg %p607_p5 }
  0x32   : > { %517 = vpow2.f32 %v235_v11  ;;  %v251_v32 = vadd.f32 %v250_v26, %v239_v25  ;;  %v272_v46 = vsel %vm271_vm3, %v267_v10, 0.0 }
  0x33   : > { %519 = vpow2.f32 %v246_v12  ;;  %p613_p13 = pnand %p612_p10, %p608_p6 }
  0x34   : > { %521 = vpow2.f32 %v257_v13  ;;  %v262_v42 = vadd.f32 %v261_v35, %v251_v32 }
  0x35   : > { %523 = vpow2.f32 %v268_v14 }
  0x36   : > { %v273_v51 = vadd.f32 %v272_v46, %v262_v42 }
  0x38   : > { %v518_v15 = vpop.eup %517 }
  0x39   : > { %v520_v16 = vpop.eup %519  ;;  %v241_v23 = vsel %vm238_vm0, %v518_v15, 0.0 }
  0x3a   : > { %v522_v17 = vpop.eup %521  ;;  %v248_v18 = vadd.f32 %v520_v16, %v518_v15  ;;  %v252_v24 = vsel %vm249_vm1, %v520_v16, 0.0 }
  0x3b   : > { %v524_v19 = vpop.eup %523  ;;  %v253_v27 = vadd.f32 %v252_v24, %v241_v23  ;;  %v263_v28 = vsel %vm260_vm2, %v522_v17, 0.0 }
  0x3c   : > { %v259_v21 = vadd.f32 %v522_v17, %v248_v18  ;;  %v274_v40 = vsel %vm271_vm3, %v524_v19, 0.0 }
  0x3d   : > { %v264_v36 = vadd.f32 %v263_v28, %v253_v27 }
  0x3e   : > { %v270_v22 = vadd.f32 %v524_v19, %v259_v21 }
  0x3f   : > { %v275_v48 = vadd.f32 %v274_v40, %v264_v36 }
  0x40   : > { %525 = vrcp.f32 %v270_v22  ;;  %v292_v37 = vand.u32 2147483648, %v270_v22  ;;  %vm286_vm4 = vweird.f32 %v270_v22  ;;  %v290_v39 = vand.u32 2147483647, %v270_v22 }
  0x41   : > { %527 = vlog2.f32 %v270_v22 }
  0x42   : > { %v293_v47 = vor.u32 1.1754944e-38, %v292_v37  ;;  %vm291_vm7 = vcmp.eq.f32.partialorder %v290_v39, 8.507059e+37 }
  0x46   : > { %v526_v29 = vpop.eup %525 }
  0x47   : > { %v282_v33 = vmul.f32 %v526_v29, %v270_v22  ;;  %vm287_vm5 = vweird.f32 %v526_v29  ;;  %v528_v44 = vpop.eup %527 }
  0x48   : > { %vm288_vm6 = vmor %vm286_vm4, %vm287_vm5  ;;  %v279_v52 = vmul.f32 0.6931472, %v528_v44 }
  0x49   : > { %v283_v38 = vsub.f32 1.0, %v282_v33 }
  0x4a   : > { %v280_v58 = vsub.f32 %v273_v51, %v279_v52 }
  0x4b   : > { %v284_v43 = vmul.f32 %v526_v29, %v283_v38 }
  0x4c   : > { %v300_v62 = vmul.f32 %v280_v58, %v277_v57 }
  0x4d   : > { %v285_v49 = vadd.f32 %v526_v29, %v284_v43 }
  0x4f   : > { %v289_v53 = vsel %vm288_vm6, %v526_v29, %v285_v49 }
  0x50   : > { %v294_v55 = vsel %vm291_vm7, %v293_v47, %v289_v53 }
  0x51   : > { %v295_v56 = vmul.f32 %v294_v55, %v275_v48 }
  0x53   : > { %v296_v59 = vsub.f32 1.0, %v295_v56 }
  0x55   : > { %v297_v60 = vmax.f32 %v296_v59, 0.0 }
  0x57   : > { %v298_v61 = vmul.f32 %v297_v60, %v297_v60 }
  0x59   : > { %v299_v63 = vsub.f32 0.0, %v298_v61 }
  0x5b   : > { %v301_v0 = vmul.f32 %v300_v62, %v299_v63 }
  0x5d   : > { %303 = vst [vmem:[%s222_s20] sm:$0xff] %v301_v0 }
  0x5e   : > { %616 = shalt.err (!%p613_p13)
}
  0x5f   : > { %451 = dma.vmem_to_hbm [thread:$0]  (%p746_p9), %s319_s26, 128, %s321_s19, %s305_s12  }
  0x60 PF: > { %s332_s3 = sand.u32 1, %s655_s9   ;;  %p461_p0 = pnand %p429_p12, %p753_p11 }
  0x61   : > { %s333_s25 = scalar_lea.sflag [#allocation4], %s332_s3 }
  0x62   : > { %p462_p1 = pneg %p461_p0 }
  0x64   : > { %650 = dma.done.wait (%p462_p1), %s333_s25, 128  }
  0x65   : > { %652 = vsyncadd (%p462_p1), %s333_s25, 4294967168  ;;  %s21_s14 = sadd.s32 1, %s675_s14   ;;  %s854_s9 = smov %s659_s10 }
  0x66   : > { %p18_p2 = scmp.ge.s32.totalorder %s21_s14, 4   ;;  %s855_s10 = smov %s663_s11 }
  0x67   : > { %s856_s11 = smov %s751_s23  ;;  %s857_s12 = smov %s671_s13 }
  0x68   : > { %s858_s13 = smov %s860_s17  ;;  %20 = sbr.rel (!%p18_p2) target bundleno = 8 (0x8), region = 89 }
  0x6d   :  { %339 = vsyncpa [#allocation3], 1 }
  0x6e   :  { %341 = vsyncpa [#allocation3 + $0x1], 1 }
  0x6f   :  { %342 = vsyncpa [#allocation6], 1 }
  0x70   :  { %344 = vsyncpa [#allocation6 + $0x1], 1 }
  0x71   :  { %345 = vsyncpa [#allocation4], 1 }
  0x72   :  { %347 = vsyncpa [#allocation4 + $0x1], 1 }

</bundles_post_ra>
